<compile_context>
chip_gen: v6e
topology: v6e:2x2x1
jax: 0.10.0
libtpu: 0.0.40
codegen_flags: <defaults>
</compile_context>

<pallas_src>
import jax
import jax.numpy as jnp
from jax.experimental import pallas as pl
from jax.experimental.pallas import tpu as pltpu

_MIB = 1024 * 1024


def _round_up(x, m):
    return ((x + m - 1) // m) * m


def _vmem_capacity_bytes():
    try:
        return int(pltpu.get_tpu_info().vmem_capacity_bytes)
    except Exception:
        return 64 * _MIB          # conservative fallback (v7x-sized)


def _choose_tile_n(n, requested):
    """Batch-tile choice: 256-multiples fill the 256-wide v6e/v7x MXU M dim
    (also 128-aligned for v5e); >= 2 grid steps whenever the batch allows so
    ("parallel", ...) can shard batch tiles across v7x's two TensorCores;
    tiny batches just round to the 8-sublane minimum (padding them to 256
    would be pure wasted FLOPs)."""
    n8 = _round_up(max(int(n), 1), 8)
    if requested is not None:
        r = int(requested)
        if r >= 256:
            return _round_up(r, 256)
        return min(_round_up(r, 8), n8)
    if n8 <= 256:
        return n8
    return 512 if n8 >= 1024 else 256


def _make_resident_kernel(num_layers, true_hidden, eps, compute_dtype, unroll):
    """All weights VMEM-resident; layer loop inside the kernel body."""
    inv_h = 1.0 / float(true_hidden)

    def kernel(x_ref, win_ref, bin_ref, wh_ref, bh_ref,
               gamma_ref, beta_ref, wout_ref, bout_ref, o_ref):
        # input layer + relu (MXU dot, f32 accumulation)
        h = jnp.dot(x_ref[...].astype(compute_dtype), win_ref[...],
                    preferred_element_type=jnp.float32)
        h = jnp.maximum(h + bin_ref[...], 0.0)

        def layer_body(l, h):
            residual = h
            z = jnp.dot(h.astype(compute_dtype), wh_ref[l],
                        preferred_element_type=jnp.float32) + bh_ref[l]
            # Fused single-pass LayerNorm stats over the TRUE hidden width.
            # Padded lanes of z are exactly zero (zero-padded weights/bias),
            # so they contribute nothing; we divide by true_hidden.
            s1 = jnp.sum(z, axis=-1, keepdims=True)
            s2 = jnp.sum(z * z, axis=-1, keepdims=True)
            mean = s1 * inv_h
            var = jnp.maximum(s2 * inv_h - mean * mean, 0.0)
            zn = (z - mean) * jax.lax.rsqrt(var + eps)
            zn = zn * gamma_ref[l] + beta_ref[l]      # padded lanes -> 0
            # relu -> dropout (identity in eval) -> residual add
            # TODO(synk): training-mode dropout would need pltpu.prng_* bits.
            return jnp.maximum(zn, 0.0) + residual

        if num_layers > 0:
            # fori_loop bounds vreg live ranges; unroll=True (small L) keeps
            # LLO visibility across the whole layer stack.
            # TODO(synk): if lowered MLIR ever shows a materialized (h_p,h_p)
            # VMEM copy for the dynamic slice wh_ref[l], prefer the streaming
            # (layer-grid) path instead.
            h = jax.lax.fori_loop(0, num_layers, layer_body, h, unroll=unroll)

        out = jnp.dot(h.astype(compute_dtype), wout_ref[...],
                      preferred_element_type=jnp.float32) + bout_ref[...]
        o_ref[...] = out.astype(o_ref.dtype)

    return kernel


def _make_stream_kernel(num_layers, true_hidden, eps, compute_dtype):
    """Layers on a grid axis: one (1, h_p, h_p) weight slab streamed (and
    auto double-buffered / prefetched) per step; the running activation is
    carried in a VMEM scratch across the layer axis."""
    inv_h = 1.0 / float(true_hidden)

    def kernel(x_ref, win_ref, bin_ref, wh_ref, bh_ref,
               gamma_ref, beta_ref, wout_ref, bout_ref, o_ref, h_scr):
        l = pl.program_id(1)

        @pl.when(l == 0)
        def _():
            h0 = jnp.dot(x_ref[...].astype(compute_dtype), win_ref[...],
                         preferred_element_type=jnp.float32)
            h_scr[...] = jnp.maximum(h0 + bin_ref[...], 0.0)

        h = h_scr[...]
        z = jnp.dot(h.astype(compute_dtype), wh_ref[0],
                    preferred_element_type=jnp.float32) + bh_ref[0]
        s1 = jnp.sum(z, axis=-1, keepdims=True)
        s2 = jnp.sum(z * z, axis=-1, keepdims=True)
        mean = s1 * inv_h
        var = jnp.maximum(s2 * inv_h - mean * mean, 0.0)
        zn = (z - mean) * jax.lax.rsqrt(var + eps)
        zn = zn * gamma_ref[0] + beta_ref[0]
        h_new = jnp.maximum(zn, 0.0) + h
        h_scr[...] = h_new

        @pl.when(l == num_layers - 1)
        def _():
            out = jnp.dot(h_new.astype(compute_dtype), wout_ref[...],
                          preferred_element_type=jnp.float32) + bout_ref[...]
            o_ref[...] = out.astype(o_ref.dtype)

    return kernel


def prepare_params(params, *, compute_dtype=jnp.bfloat16):
    """Pad feature dims to 128-lane multiples and cast weights to the matmul
    dtype ONCE, outside the hot path.  gamma/beta padded lanes are ZERO — the
    kernels rely on this invariant to keep padded lanes identically zero
    through the residual stream."""
    d_in, h_dim = params["w_in"].shape
    o_dim = params["w_out"].shape[1]
    num_layers = params["w_h"].shape[0]

    d_in_p = _round_up(d_in, 128)
    h_p = _round_up(h_dim, 128)
    o_p = _round_up(o_dim, 128)
    # TODO(synk): on v6e/v7x consider bumping h_p to a 256 multiple when the
    # true width is within ~10-15% of the next 256 boundary (full MXU fill).

    def pad2(a, r, c):
        return jnp.pad(a, ((0, r - a.shape[0]), (0, c - a.shape[1])))

    def pad3(a, r, c):
        return jnp.pad(a, ((0, 0), (0, r - a.shape[1]), (0, c - a.shape[2])))

    w_h, b_h = params["w_h"], params["b_h"]
    gamma, beta = params["ln_gamma"], params["ln_beta"]
    if num_layers == 0:                       # keep BlockSpecs well-formed
        w_h = jnp.zeros((1, h_dim, h_dim), jnp.float32)
        b_h = jnp.zeros((1, 1, h_dim), jnp.float32)
        gamma = jnp.ones((1, 1, h_dim), jnp.float32)
        beta = jnp.zeros((1, 1, h_dim), jnp.float32)

    prep = {
        "w_in": pad2(params["w_in"], d_in_p, h_p).astype(compute_dtype),
        "b_in": pad2(params["b_in"], 1, h_p).astype(jnp.float32),
        "w_h": pad3(w_h, h_p, h_p).astype(compute_dtype),
        "b_h": pad3(b_h, 1, h_p).astype(jnp.float32),
        "gamma": pad3(gamma, 1, h_p).astype(jnp.float32),
        "beta": pad3(beta, 1, h_p).astype(jnp.float32),
        "w_out": pad2(params["w_out"], h_p, o_p).astype(compute_dtype),
        "b_out": pad2(params["b_out"], 1, o_p).astype(jnp.float32),
    }
    meta = dict(d_in=d_in, h_dim=h_dim, o_dim=o_dim, num_layers=num_layers,
                d_in_p=d_in_p, h_p=h_p, o_p=o_p,
                compute_dtype=jnp.dtype(compute_dtype))
    return prep, meta


def residual_mlp_prepared(x, prep, meta, *, tile_n=None, eps=1e-5,
                          out_dtype=None, stream=None, unroll_threshold=8):
    """x: (N, input_dim).  prep/meta from prepare_params()."""
    n, d_in = x.shape
    assert d_in == meta["d_in"], "input feature dim mismatch"
    h_dim, o_dim = meta["h_dim"], meta["o_dim"]
    num_layers = meta["num_layers"]
    d_in_p, h_p, o_p = meta["d_in_p"], meta["h_p"], meta["o_p"]
    compute_dtype = meta["compute_dtype"]
    out_dtype = x.dtype if out_dtype is None else jnp.dtype(out_dtype)
    L_eff = max(num_layers, 1)

    tile = _choose_tile_n(n, tile_n)
    n_p = _round_up(n, tile)
    grid_n = n_p // tile

    wbytes = jnp.dtype(compute_dtype).itemsize
    obytes = jnp.dtype(out_dtype).itemsize

    # ---- generation-aware VMEM budget -----------------------------------
    vmem_cap = _vmem_capacity_bytes()
    vmem_limit = int(min(vmem_cap, max(32 * _MIB, vmem_cap - 12 * _MIB)))

    weight_bytes = (d_in_p * h_p + L_eff * h_p * h_p + h_p * o_p) * wbytes
    small_bytes = (h_p + 3 * L_eff * h_p + o_p) * 4
    act_bytes = 2 * tile * d_in_p * wbytes + 2 * tile * o_p * obytes
    work_bytes = 6 * tile * h_p * 4
    resident_total = weight_bytes + small_bytes + act_bytes + work_bytes + 2 * _MIB

    if stream is None:
        stream = resident_total > vmem_limit
    stream = bool(stream) and num_layers > 0

    x_p = jnp.pad(x, ((0, n_p - n), (0, d_in_p - d_in))).astype(compute_dtype)

    flops = 2 * n_p * (d_in_p * h_p + num_layers * h_p * h_p + h_p * o_p)
    buf1 = pl.Buffered(1)   # constant-index (resident) inputs: single buffer

    if not stream:
        unroll = True if num_layers <= unroll_threshold else 2
        kernel = _make_resident_kernel(num_layers, h_dim, eps,
                                       compute_dtype, unroll)

        def resident(shape):
            return pl.BlockSpec(shape, lambda i: (0,) * len(shape),
                                pipeline_mode=buf1)

        grid = (grid_n,)
        in_specs = [
            pl.BlockSpec((tile, d_in_p), lambda i: (i, 0)),     # x (pipelined)
            resident((d_in_p, h_p)),                            # w_in
            resident((1, h_p)),                                 # b_in
            resident((L_eff, h_p, h_p)),                        # w_h
            resident((L_eff, 1, h_p)),                          # b_h
            resident((L_eff, 1, h_p)),                          # gamma
            resident((L_eff, 1, h_p)),                          # beta
            resident((h_p, o_p)),                               # w_out
            resident((1, o_p)),                                 # b_out
        ]
        out_specs = pl.BlockSpec((tile, o_p), lambda i: (i, 0))
        scratch_shapes = []
        dims = ("parallel",)
        bytes_accessed = (n_p * d_in_p * wbytes + weight_bytes + small_bytes
                          + n_p * o_p * obytes)
    else:
        kernel = _make_stream_kernel(num_layers, h_dim, eps, compute_dtype)

        def resident(shape):
            return pl.BlockSpec(shape, lambda i, l: (0,) * len(shape),
                                pipeline_mode=buf1)

        grid = (grid_n, num_layers)
        in_specs = [
            pl.BlockSpec((tile, d_in_p), lambda i, l: (i, 0)),   # x
            resident((d_in_p, h_p)),                             # w_in
            resident((1, h_p)),                                  # b_in
            # streamed weight slab: layer l+1 prefetched while computing l
            pl.BlockSpec((1, h_p, h_p), lambda i, l: (l, 0, 0)),
            pl.BlockSpec((1, 1, h_p), lambda i, l: (l, 0, 0)),   # b_h
            pl.BlockSpec((1, 1, h_p), lambda i, l: (l, 0, 0)),   # gamma
            pl.BlockSpec((1, 1, h_p), lambda i, l: (l, 0, 0)),   # beta
            resident((h_p, o_p)),                                # w_out
            resident((1, o_p)),                                  # b_out
        ]
        out_specs = pl.BlockSpec((tile, o_p), lambda i, l: (i, 0))
        scratch_shapes = [pltpu.VMEM((tile, h_p), jnp.float32)]
        dims = ("parallel", "arbitrary")
        bytes_accessed = (n_p * d_in_p * wbytes
                          + (d_in_p * h_p + h_p * o_p) * wbytes + small_bytes
                          + grid_n * num_layers * h_p * h_p * wbytes
                          + n_p * o_p * obytes)

    cost = pl.CostEstimate(flops=int(flops),
                           transcendentals=int(n_p * L_eff),
                           bytes_accessed=int(bytes_accessed))

    out_p = pl.pallas_call(
        kernel,
        out_shape=jax.ShapeDtypeStruct((n_p, o_p), out_dtype),
        grid=grid,
        in_specs=in_specs,
        out_specs=out_specs,
        scratch_shapes=scratch_shapes,
        compiler_params=pltpu.CompilerParams(
            dimension_semantics=dims,
            vmem_limit_bytes=vmem_limit),
        cost_estimate=cost,
    )(x_p, prep["w_in"], prep["b_in"], prep["w_h"], prep["b_h"],
      prep["gamma"], prep["beta"], prep["w_out"], prep["b_out"])

    return out_p[:n, :o_dim]


def residual_mlp(x, params, *, compute_dtype=jnp.bfloat16, **kwargs):
    """Convenience wrapper (pads/casts params on every call).  For repeated
    calls, run prepare_params() once and jit residual_mlp_prepared instead."""
    prep, meta = prepare_params(params, compute_dtype=compute_dtype)
    return residual_mlp_prepared(x, prep, meta, **kwargs)


def init_params(key, input_dim, hidden_dim, output_dim, num_layers):
    """Deterministic synthetic parameters (PyTorch-ish uniform fan-in init).
    Linear weights are stored transposed vs PyTorch, i.e. (in, out)."""
    ks = jax.random.split(key, 6)

    def lin(k, fan_in, fan_out):
        bound = 1.0 / jnp.sqrt(fan_in)
        kw, kb = jax.random.split(k)
        w = jax.random.uniform(kw, (fan_in, fan_out), jnp.float32, -bound, bound)
        b = jax.random.uniform(kb, (1, fan_out), jnp.float32, -bound, bound)
        return w, b

    w_in, b_in = lin(ks[0], input_dim, hidden_dim)
    w_h_list, b_h_list = [], []
    hk = jax.random.split(ks[1], max(num_layers, 1))
    for l in range(num_layers):
        w, b = lin(hk[l], hidden_dim, hidden_dim)
        w_h_list.append(w)
        b_h_list.append(b)
    if num_layers > 0:
        w_h = jnp.stack(w_h_list, axis=0)                    # (L, H, H)
        b_h = jnp.stack(b_h_list, axis=0)                    # (L, 1, H)
    else:
        w_h = jnp.zeros((0, hidden_dim, hidden_dim), jnp.float32)
        b_h = jnp.zeros((0, 1, hidden_dim), jnp.float32)
    ln_gamma = jnp.ones((num_layers, 1, hidden_dim), jnp.float32)
    ln_beta = jnp.zeros((num_layers, 1, hidden_dim), jnp.float32)
    w_out, b_out = lin(ks[2], hidden_dim, output_dim)
    return {"w_in": w_in, "b_in": b_in,
            "w_h": w_h, "b_h": b_h,
            "ln_gamma": ln_gamma, "ln_beta": ln_beta,
            "w_out": w_out, "b_out": b_out}


def residual_mlp_reference(x, p):
    """Pure-JAX reference of the PyTorch forward (eval mode)."""
    h = jnp.maximum(x @ p["w_in"] + p["b_in"], 0.0)
    L = p["w_h"].shape[0]
    for l in range(L):
        residual = h
        z = h @ p["w_h"][l] + p["b_h"][l]
        mean = jnp.mean(z, axis=-1, keepdims=True)
        var = jnp.mean((z - mean) ** 2, axis=-1, keepdims=True)
        zn = (z - mean) / jnp.sqrt(var + 1e-5)
        zn = zn * p["ln_gamma"][l] + p["ln_beta"][l]
        h = jnp.maximum(zn, 0.0) + residual
    return h @ p["w_out"] + p["b_out"]


if __name__ == "__main__":
    # Small demo shapes consistent with the module.
    input_dim, hidden_dim, output_dim, num_layers = 16, 32, 8, 3
    batch = 8

    key = jax.random.PRNGKey(0)
    kx, kp = jax.random.split(key)
    x = jax.random.normal(kx, (batch, input_dim), jnp.float32)
    params = init_params(kp, input_dim, hidden_dim, output_dim, num_layers)
    ref = residual_mlp_reference(x, params)

    # 1) f32 matmuls; params padded ONCE + jitted wrapper (padding hoisted
    #    out of the hot path).  Tight check against the pure-JAX reference.
    prep32, meta32 = prepare_params(params, compute_dtype=jnp.float32)
    fwd32 = jax.jit(lambda xx: residual_mlp_prepared(xx, prep32, meta32))
    out_f32 = jax.block_until_ready(fwd32(x))
    assert out_f32.shape == (batch, output_dim)
    assert jnp.allclose(out_f32, ref, atol=1e-4, rtol=1e-4), "f32 mismatch"

    # 2) Default path: bf16 matmul inputs (MXU-native), f32 accumulation.
    out_bf16 = jax.block_until_ready(residual_mlp(x, params))
    assert out_bf16.shape == (batch, output_dim)
    rel = jnp.max(jnp.abs(out_bf16 - ref)) / (jnp.max(jnp.abs(ref)) + 1e-6)
    assert rel < 5e-2, f"bf16 mismatch (rel err {rel})"

    # 3) Larger config: multiple 256-aligned batch tiles, feature padding,
    #    and the partially-unrolled fori_loop layer path (L > threshold).
    in2, hid2, out2, l2, batch2 = 24, 96, 10, 10, 300
    k2x, k2p = jax.random.split(jax.random.PRNGKey(1))
    x2 = jax.random.normal(k2x, (batch2, in2), jnp.float32)
    p2 = init_params(k2p, in2, hid2, out2, l2)
    ref2 = residual_mlp_reference(x2, p2)
    prep2, meta2 = prepare_params(p2, compute_dtype=jnp.float32)
    got2 = jax.block_until_ready(residual_mlp_prepared(x2, prep2, meta2))
    assert got2.shape == (batch2, out2)
    assert jnp.allclose(got2, ref2, atol=1e-3, rtol=1e-3), "resident mismatch"

    # 4) Streaming path (forced): layers on an 'arbitrary' grid axis, one w_h
    #    slab auto-pipelined per step — the fallback for when L*h_p^2 exceeds
    #    the VMEM budget (e.g. v7x's 64 MiB).
    got3 = jax.block_until_ready(
        residual_mlp_prepared(x2, prep2, meta2, stream=True))
    assert got3.shape == (batch2, out2)
    assert jnp.allclose(got3, ref2, atol=1e-3, rtol=1e-3), "streaming mismatch"

    print("KERNEL_OK")
</pallas_src>

<mosaic_0001>
module attributes {stable_mosaic.version = 11 : i64} {
  func.func @kernel(%arg0: i32, %arg1: memref<8x128xf32, #tpu.memory_space<vmem>>, %arg2: memref<128x128xf32, #tpu.memory_space<vmem>>, %arg3: memref<1x128xf32, #tpu.memory_space<vmem>>, %arg4: memref<3x128x128xf32, #tpu.memory_space<vmem>>, %arg5: memref<3x1x128xf32, #tpu.memory_space<vmem>>, %arg6: memref<3x1x128xf32, #tpu.memory_space<vmem>>, %arg7: memref<3x1x128xf32, #tpu.memory_space<vmem>>, %arg8: memref<128x128xf32, #tpu.memory_space<vmem>>, %arg9: memref<1x128xf32, #tpu.memory_space<vmem>>, %arg10: memref<8x128xf32, #tpu.memory_space<vmem>>) attributes {dimension_semantics = [#tpu.dimension_semantics<parallel>], iteration_bounds = array<i64: 1>, scalar_prefetch = 0 : i64, scratch_operands = 0 : i64, tpu.core_type = #tpu.core_type<tc>, window_params = [{transform_indices = @transform_0, window_bounds = array<i64: 8, 128>}, {pipeline_mode = #tpu.pipeline_mode<synchronous>, transform_indices = @transform_1, window_bounds = array<i64: 128, 128>}, {pipeline_mode = #tpu.pipeline_mode<synchronous>, transform_indices = @transform_2, window_bounds = array<i64: 1, 128>}, {pipeline_mode = #tpu.pipeline_mode<synchronous>, transform_indices = @transform_3, window_bounds = array<i64: 3, 128, 128>}, {pipeline_mode = #tpu.pipeline_mode<synchronous>, transform_indices = @transform_4, window_bounds = array<i64: 3, 1, 128>}, {pipeline_mode = #tpu.pipeline_mode<synchronous>, transform_indices = @transform_5, window_bounds = array<i64: 3, 1, 128>}, {pipeline_mode = #tpu.pipeline_mode<synchronous>, transform_indices = @transform_6, window_bounds = array<i64: 3, 1, 128>}, {pipeline_mode = #tpu.pipeline_mode<synchronous>, transform_indices = @transform_7, window_bounds = array<i64: 128, 128>}, {pipeline_mode = #tpu.pipeline_mode<synchronous>, transform_indices = @transform_8, window_bounds = array<i64: 1, 128>}, {transform_indices = @transform_9, window_bounds = array<i64: 8, 128>}]} {
    %c0 = arith.constant 0 : index
    %c0_0 = arith.constant 0 : index
    %0 = vector.load %arg1[%c0, %c0_0] : memref<8x128xf32, #tpu.memory_space<vmem>>, vector<8x128xf32>
    %c0_1 = arith.constant 0 : index
    %c0_2 = arith.constant 0 : index
    %1 = vector.load %arg2[%c0_1, %c0_2] : memref<128x128xf32, #tpu.memory_space<vmem>>, vector<128x128xf32>
    %cst = arith.constant dense<0.000000e+00> : vector<8x128xf32>
    %2 = tpu.matmul %0, %1, %cst {dimension_numbers = #tpu.dot_dimension_numbers<[1], [0], [0], [1], [0, 0, 1, 1], [], []>} : vector<8x128xf32>, vector<128x128xf32>, vector<8x128xf32> -> vector<8x128xf32>
    %c0_3 = arith.constant 0 : index
    %c0_4 = arith.constant 0 : index
    %3 = vector.load %arg3[%c0_3, %c0_4] : memref<1x128xf32, #tpu.memory_space<vmem>>, vector<1x128xf32>
    %4 = vector.broadcast %3 : vector<1x128xf32> to vector<8x128xf32>
    %5 = arith.addf %2, %4 : vector<8x128xf32>
    %cst_5 = arith.constant 0.000000e+00 : f32
    %6 = vector.broadcast %cst_5 : f32 to vector<8x128xf32>
    %7 = arith.maximumf %5, %6 : vector<8x128xf32>
    %c0_i32 = arith.constant 0 : i32
    %8 = arith.index_cast %c0_i32 : i32 to index
    %c0_6 = arith.constant 0 : index
    %c0_7 = arith.constant 0 : index
    %9 = vector.load %arg4[%8, %c0_6, %c0_7] : memref<3x128x128xf32, #tpu.memory_space<vmem>>, vector<1x128x128xf32>
    %10 = vector.shape_cast %9 : vector<1x128x128xf32> to vector<128x128xf32>
    %cst_8 = arith.constant dense<0.000000e+00> : vector<8x128xf32>
    %11 = tpu.matmul %7, %10, %cst_8 {dimension_numbers = #tpu.dot_dimension_numbers<[1], [0], [0], [1], [0, 0, 1, 1], [], []>} : vector<8x128xf32>, vector<128x128xf32>, vector<8x128xf32> -> vector<8x128xf32>
    %12 = arith.index_cast %c0_i32 : i32 to index
    %c0_9 = arith.constant 0 : index
    %c0_10 = arith.constant 0 : index
    %13 = vector.load %arg5[%12, %c0_9, %c0_10] : memref<3x1x128xf32, #tpu.memory_space<vmem>>, vector<1x1x128xf32>
    %14 = vector.shape_cast %13 : vector<1x1x128xf32> to vector<1x128xf32>
    %15 = vector.broadcast %14 : vector<1x128xf32> to vector<8x128xf32>
    %16 = arith.addf %11, %15 : vector<8x128xf32>
    %cst_11 = arith.constant dense<0.000000e+00> : vector<8xf32>
    %17 = vector.multi_reduction <add>, %16, %cst_11 [1] : vector<8x128xf32> to vector<8xf32>
    %18 = vector.shape_cast %17 : vector<8xf32> to vector<8x1xf32>
    %19 = arith.mulf %16, %16 : vector<8x128xf32>
    %cst_12 = arith.constant dense<0.000000e+00> : vector<8xf32>
    %20 = vector.multi_reduction <add>, %19, %cst_12 [1] : vector<8x128xf32> to vector<8xf32>
    %21 = vector.shape_cast %20 : vector<8xf32> to vector<8x1xf32>
    %cst_13 = arith.constant 3.125000e-02 : f32
    %22 = vector.broadcast %cst_13 : f32 to vector<8x1xf32>
    %23 = arith.mulf %18, %22 : vector<8x1xf32>
    %cst_14 = arith.constant 3.125000e-02 : f32
    %24 = vector.broadcast %cst_14 : f32 to vector<8x1xf32>
    %25 = arith.mulf %21, %24 : vector<8x1xf32>
    %26 = arith.mulf %23, %23 : vector<8x1xf32>
    %27 = arith.subf %25, %26 : vector<8x1xf32>
    %cst_15 = arith.constant 0.000000e+00 : f32
    %28 = vector.broadcast %cst_15 : f32 to vector<8x1xf32>
    %29 = arith.maximumf %27, %28 : vector<8x1xf32>
    %30 = vector.broadcast %23 : vector<8x1xf32> to vector<8x128xf32>
    %31 = arith.subf %16, %30 : vector<8x128xf32>
    %cst_16 = arith.constant 9.99999974E-6 : f32
    %32 = vector.broadcast %cst_16 : f32 to vector<8x1xf32>
    %33 = arith.addf %29, %32 : vector<8x1xf32>
    %34 = math.rsqrt %33 : vector<8x1xf32>
    %35 = vector.broadcast %34 : vector<8x1xf32> to vector<8x128xf32>
    %36 = arith.mulf %31, %35 : vector<8x128xf32>
    %37 = arith.index_cast %c0_i32 : i32 to index
    %c0_17 = arith.constant 0 : index
    %c0_18 = arith.constant 0 : index
    %38 = vector.load %arg6[%37, %c0_17, %c0_18] : memref<3x1x128xf32, #tpu.memory_space<vmem>>, vector<1x1x128xf32>
    %39 = vector.shape_cast %38 : vector<1x1x128xf32> to vector<1x128xf32>
    %40 = vector.broadcast %39 : vector<1x128xf32> to vector<8x128xf32>
    %41 = arith.mulf %36, %40 : vector<8x128xf32>
    %42 = arith.index_cast %c0_i32 : i32 to index
    %c0_19 = arith.constant 0 : index
    %c0_20 = arith.constant 0 : index
    %43 = vector.load %arg7[%42, %c0_19, %c0_20] : memref<3x1x128xf32, #tpu.memory_space<vmem>>, vector<1x1x128xf32>
    %44 = vector.shape_cast %43 : vector<1x1x128xf32> to vector<1x128xf32>
    %45 = vector.broadcast %44 : vector<1x128xf32> to vector<8x128xf32>
    %46 = arith.addf %41, %45 : vector<8x128xf32>
    %cst_21 = arith.constant 0.000000e+00 : f32
    %47 = vector.broadcast %cst_21 : f32 to vector<8x128xf32>
    %48 = arith.maximumf %46, %47 : vector<8x128xf32>
    %49 = arith.addf %48, %7 : vector<8x128xf32>
    %c1_i32 = arith.constant 1 : i32
    %50 = arith.index_cast %c1_i32 : i32 to index
    %c0_22 = arith.constant 0 : index
    %c0_23 = arith.constant 0 : index
    %51 = vector.load %arg4[%50, %c0_22, %c0_23] : memref<3x128x128xf32, #tpu.memory_space<vmem>>, vector<1x128x128xf32>
    %52 = vector.shape_cast %51 : vector<1x128x128xf32> to vector<128x128xf32>
    %cst_24 = arith.constant dense<0.000000e+00> : vector<8x128xf32>
    %53 = tpu.matmul %49, %52, %cst_24 {dimension_numbers = #tpu.dot_dimension_numbers<[1], [0], [0], [1], [0, 0, 1, 1], [], []>} : vector<8x128xf32>, vector<128x128xf32>, vector<8x128xf32> -> vector<8x128xf32>
    %54 = arith.index_cast %c1_i32 : i32 to index
    %c0_25 = arith.constant 0 : index
    %c0_26 = arith.constant 0 : index
    %55 = vector.load %arg5[%54, %c0_25, %c0_26] : memref<3x1x128xf32, #tpu.memory_space<vmem>>, vector<1x1x128xf32>
    %56 = vector.shape_cast %55 : vector<1x1x128xf32> to vector<1x128xf32>
    %57 = vector.broadcast %56 : vector<1x128xf32> to vector<8x128xf32>
    %58 = arith.addf %53, %57 : vector<8x128xf32>
    %cst_27 = arith.constant dense<0.000000e+00> : vector<8xf32>
    %59 = vector.multi_reduction <add>, %58, %cst_27 [1] : vector<8x128xf32> to vector<8xf32>
    %60 = vector.shape_cast %59 : vector<8xf32> to vector<8x1xf32>
    %61 = arith.mulf %58, %58 : vector<8x128xf32>
    %cst_28 = arith.constant dense<0.000000e+00> : vector<8xf32>
    %62 = vector.multi_reduction <add>, %61, %cst_28 [1] : vector<8x128xf32> to vector<8xf32>
    %63 = vector.shape_cast %62 : vector<8xf32> to vector<8x1xf32>
    %cst_29 = arith.constant 3.125000e-02 : f32
    %64 = vector.broadcast %cst_29 : f32 to vector<8x1xf32>
    %65 = arith.mulf %60, %64 : vector<8x1xf32>
    %cst_30 = arith.constant 3.125000e-02 : f32
    %66 = vector.broadcast %cst_30 : f32 to vector<8x1xf32>
    %67 = arith.mulf %63, %66 : vector<8x1xf32>
    %68 = arith.mulf %65, %65 : vector<8x1xf32>
    %69 = arith.subf %67, %68 : vector<8x1xf32>
    %cst_31 = arith.constant 0.000000e+00 : f32
    %70 = vector.broadcast %cst_31 : f32 to vector<8x1xf32>
    %71 = arith.maximumf %69, %70 : vector<8x1xf32>
    %72 = vector.broadcast %65 : vector<8x1xf32> to vector<8x128xf32>
    %73 = arith.subf %58, %72 : vector<8x128xf32>
    %cst_32 = arith.constant 9.99999974E-6 : f32
    %74 = vector.broadcast %cst_32 : f32 to vector<8x1xf32>
    %75 = arith.addf %71, %74 : vector<8x1xf32>
    %76 = math.rsqrt %75 : vector<8x1xf32>
    %77 = vector.broadcast %76 : vector<8x1xf32> to vector<8x128xf32>
    %78 = arith.mulf %73, %77 : vector<8x128xf32>
    %79 = arith.index_cast %c1_i32 : i32 to index
    %c0_33 = arith.constant 0 : index
    %c0_34 = arith.constant 0 : index
    %80 = vector.load %arg6[%79, %c0_33, %c0_34] : memref<3x1x128xf32, #tpu.memory_space<vmem>>, vector<1x1x128xf32>
    %81 = vector.shape_cast %80 : vector<1x1x128xf32> to vector<1x128xf32>
    %82 = vector.broadcast %81 : vector<1x128xf32> to vector<8x128xf32>
    %83 = arith.mulf %78, %82 : vector<8x128xf32>
    %84 = arith.index_cast %c1_i32 : i32 to index
    %c0_35 = arith.constant 0 : index
    %c0_36 = arith.constant 0 : index
    %85 = vector.load %arg7[%84, %c0_35, %c0_36] : memref<3x1x128xf32, #tpu.memory_space<vmem>>, vector<1x1x128xf32>
    %86 = vector.shape_cast %85 : vector<1x1x128xf32> to vector<1x128xf32>
    %87 = vector.broadcast %86 : vector<1x128xf32> to vector<8x128xf32>
    %88 = arith.addf %83, %87 : vector<8x128xf32>
    %cst_37 = arith.constant 0.000000e+00 : f32
    %89 = vector.broadcast %cst_37 : f32 to vector<8x128xf32>
    %90 = arith.maximumf %88, %89 : vector<8x128xf32>
    %91 = arith.addf %90, %49 : vector<8x128xf32>
    %c2_i32 = arith.constant 2 : i32
    %92 = arith.index_cast %c2_i32 : i32 to index
    %c0_38 = arith.constant 0 : index
    %c0_39 = arith.constant 0 : index
    %93 = vector.load %arg4[%92, %c0_38, %c0_39] : memref<3x128x128xf32, #tpu.memory_space<vmem>>, vector<1x128x128xf32>
    %94 = vector.shape_cast %93 : vector<1x128x128xf32> to vector<128x128xf32>
    %cst_40 = arith.constant dense<0.000000e+00> : vector<8x128xf32>
    %95 = tpu.matmul %91, %94, %cst_40 {dimension_numbers = #tpu.dot_dimension_numbers<[1], [0], [0], [1], [0, 0, 1, 1], [], []>} : vector<8x128xf32>, vector<128x128xf32>, vector<8x128xf32> -> vector<8x128xf32>
    %96 = arith.index_cast %c2_i32 : i32 to index
    %c0_41 = arith.constant 0 : index
    %c0_42 = arith.constant 0 : index
    %97 = vector.load %arg5[%96, %c0_41, %c0_42] : memref<3x1x128xf32, #tpu.memory_space<vmem>>, vector<1x1x128xf32>
    %98 = vector.shape_cast %97 : vector<1x1x128xf32> to vector<1x128xf32>
    %99 = vector.broadcast %98 : vector<1x128xf32> to vector<8x128xf32>
    %100 = arith.addf %95, %99 : vector<8x128xf32>
    %cst_43 = arith.constant dense<0.000000e+00> : vector<8xf32>
    %101 = vector.multi_reduction <add>, %100, %cst_43 [1] : vector<8x128xf32> to vector<8xf32>
    %102 = vector.shape_cast %101 : vector<8xf32> to vector<8x1xf32>
    %103 = arith.mulf %100, %100 : vector<8x128xf32>
    %cst_44 = arith.constant dense<0.000000e+00> : vector<8xf32>
    %104 = vector.multi_reduction <add>, %103, %cst_44 [1] : vector<8x128xf32> to vector<8xf32>
    %105 = vector.shape_cast %104 : vector<8xf32> to vector<8x1xf32>
    %cst_45 = arith.constant 3.125000e-02 : f32
    %106 = vector.broadcast %cst_45 : f32 to vector<8x1xf32>
    %107 = arith.mulf %102, %106 : vector<8x1xf32>
    %cst_46 = arith.constant 3.125000e-02 : f32
    %108 = vector.broadcast %cst_46 : f32 to vector<8x1xf32>
    %109 = arith.mulf %105, %108 : vector<8x1xf32>
    %110 = arith.mulf %107, %107 : vector<8x1xf32>
    %111 = arith.subf %109, %110 : vector<8x1xf32>
    %cst_47 = arith.constant 0.000000e+00 : f32
    %112 = vector.broadcast %cst_47 : f32 to vector<8x1xf32>
    %113 = arith.maximumf %111, %112 : vector<8x1xf32>
    %114 = vector.broadcast %107 : vector<8x1xf32> to vector<8x128xf32>
    %115 = arith.subf %100, %114 : vector<8x128xf32>
    %cst_48 = arith.constant 9.99999974E-6 : f32
    %116 = vector.broadcast %cst_48 : f32 to vector<8x1xf32>
    %117 = arith.addf %113, %116 : vector<8x1xf32>
    %118 = math.rsqrt %117 : vector<8x1xf32>
    %119 = vector.broadcast %118 : vector<8x1xf32> to vector<8x128xf32>
    %120 = arith.mulf %115, %119 : vector<8x128xf32>
    %121 = arith.index_cast %c2_i32 : i32 to index
    %c0_49 = arith.constant 0 : index
    %c0_50 = arith.constant 0 : index
    %122 = vector.load %arg6[%121, %c0_49, %c0_50] : memref<3x1x128xf32, #tpu.memory_space<vmem>>, vector<1x1x128xf32>
    %123 = vector.shape_cast %122 : vector<1x1x128xf32> to vector<1x128xf32>
    %124 = vector.broadcast %123 : vector<1x128xf32> to vector<8x128xf32>
    %125 = arith.mulf %120, %124 : vector<8x128xf32>
    %126 = arith.index_cast %c2_i32 : i32 to index
    %c0_51 = arith.constant 0 : index
    %c0_52 = arith.constant 0 : index
    %127 = vector.load %arg7[%126, %c0_51, %c0_52] : memref<3x1x128xf32, #tpu.memory_space<vmem>>, vector<1x1x128xf32>
    %128 = vector.shape_cast %127 : vector<1x1x128xf32> to vector<1x128xf32>
    %129 = vector.broadcast %128 : vector<1x128xf32> to vector<8x128xf32>
    %130 = arith.addf %125, %129 : vector<8x128xf32>
    %cst_53 = arith.constant 0.000000e+00 : f32
    %131 = vector.broadcast %cst_53 : f32 to vector<8x128xf32>
    %132 = arith.maximumf %130, %131 : vector<8x128xf32>
    %133 = arith.addf %132, %91 : vector<8x128xf32>
    %c3_i32 = arith.constant 3 : i32
    %c0_54 = arith.constant 0 : index
    %c0_55 = arith.constant 0 : index
    %134 = vector.load %arg8[%c0_54, %c0_55] : memref<128x128xf32, #tpu.memory_space<vmem>>, vector<128x128xf32>
    %cst_56 = arith.constant dense<0.000000e+00> : vector<8x128xf32>
    %135 = tpu.matmul %133, %134, %cst_56 {dimension_numbers = #tpu.dot_dimension_numbers<[1], [0], [0], [1], [0, 0, 1, 1], [], []>} : vector<8x128xf32>, vector<128x128xf32>, vector<8x128xf32> -> vector<8x128xf32>
    %c0_57 = arith.constant 0 : index
    %c0_58 = arith.constant 0 : index
    %136 = vector.load %arg9[%c0_57, %c0_58] : memref<1x128xf32, #tpu.memory_space<vmem>>, vector<1x128xf32>
    %137 = vector.broadcast %136 : vector<1x128xf32> to vector<8x128xf32>
    %138 = arith.addf %135, %137 : vector<8x128xf32>
    %c0_59 = arith.constant 0 : index
    %c0_60 = arith.constant 0 : index
    %139 = vector.load %arg10[%c0_59, %c0_60] : memref<8x128xf32, #tpu.memory_space<vmem>>, vector<8x128xf32>
    tpu.vector_store %arg10[%c0_59, %c0_60], %138 {strides = array<i32>} : memref<8x128xf32, #tpu.memory_space<vmem>>, vector<8x128xf32>,
    return
  }
  func.func @transform_0(%arg0: i32) -> (i32, i32) {
    %c0_i32 = arith.constant 0 : i32
    %c0_i32_0 = arith.constant 0 : i32
    return %arg0, %c0_i32 : i32, i32
  }
  func.func @transform_1(%arg0: i32) -> (i32, i32) {
    %c0_i32 = arith.constant 0 : i32
    %c0_i32_0 = arith.constant 0 : i32
    %c0_i32_1 = arith.constant 0 : i32
    return %c0_i32, %c0_i32_0 : i32, i32
  }
  func.func @transform_2(%arg0: i32) -> (i32, i32) {
    %c0_i32 = arith.constant 0 : i32
    %c0_i32_0 = arith.constant 0 : i32
    %c0_i32_1 = arith.constant 0 : i32
    return %c0_i32, %c0_i32_0 : i32, i32
  }
  func.func @transform_3(%arg0: i32) -> (i32, i32, i32) {
    %c0_i32 = arith.constant 0 : i32
    %c0_i32_0 = arith.constant 0 : i32
    %c0_i32_1 = arith.constant 0 : i32
    %c0_i32_2 = arith.constant 0 : i32
    return %c0_i32, %c0_i32_0, %c0_i32_1 : i32, i32, i32
  }
  func.func @transform_4(%arg0: i32) -> (i32, i32, i32) {
    %c0_i32 = arith.constant 0 : i32
    %c0_i32_0 = arith.constant 0 : i32
    %c0_i32_1 = arith.constant 0 : i32
    %c0_i32_2 = arith.constant 0 : i32
    return %c0_i32, %c0_i32_0, %c0_i32_1 : i32, i32, i32
  }
  func.func @transform_5(%arg0: i32) -> (i32, i32, i32) {
    %c0_i32 = arith.constant 0 : i32
    %c0_i32_0 = arith.constant 0 : i32
    %c0_i32_1 = arith.constant 0 : i32
    %c0_i32_2 = arith.constant 0 : i32
    return %c0_i32, %c0_i32_0, %c0_i32_1 : i32, i32, i32
  }
  func.func @transform_6(%arg0: i32) -> (i32, i32, i32) {
    %c0_i32 = arith.constant 0 : i32
    %c0_i32_0 = arith.constant 0 : i32
    %c0_i32_1 = arith.constant 0 : i32
    %c0_i32_2 = arith.constant 0 : i32
    return %c0_i32, %c0_i32_0, %c0_i32_1 : i32, i32, i32
  }
  func.func @transform_7(%arg0: i32) -> (i32, i32) {
    %c0_i32 = arith.constant 0 : i32
    %c0_i32_0 = arith.constant 0 : i32
    %c0_i32_1 = arith.constant 0 : i32
    return %c0_i32, %c0_i32_0 : i32, i32
  }
  func.func @transform_8(%arg0: i32) -> (i32, i32) {
    %c0_i32 = arith.constant 0 : i32
    %c0_i32_0 = arith.constant 0 : i32
    %c0_i32_1 = arith.constant 0 : i32
    return %c0_i32, %c0_i32_0 : i32, i32
  }
  func.func @transform_9(%arg0: i32) -> (i32, i32) {
    %c0_i32 = arith.constant 0 : i32
    %c0_i32_0 = arith.constant 0 : i32
    return %arg0, %c0_i32 : i32, i32
  }
}

</mosaic_0001>

<bundles_post_ra>
// kernel: _lambda_.1
= control target key start
LH: loop header
LB: loop body
LE: loop exit
PB: predicated region body
PF: predicated region fallthrough
CT: control target
= control target key end

     0   :  { %14 = vsyncpa [#allocation3], 0  ;;  %s1268_s0 = inlined_call_operand.vmem [shape: f32[8,128], index: 0, kind: input, shape index: {}]   ;;  %s1269_s1 = inlined_call_operand.hbm [shape: f32[128,128], index: 1, kind: input, shape index: {}]   ;;  %s1270_s2 = inlined_call_operand.vmem [shape: f32[1,128], index: 2, kind: input, shape index: {}]   ;;  %s1271_s3 = inlined_call_operand.hbm [shape: f32[3,128,128], index: 3, kind: input, shape index: {}]   ;;  %s1272_s4 = inlined_call_operand.vmem [shape: f32[3,1,128], index: 4, kind: input, shape index: {}]   ;;  %s1273_s5 = inlined_call_operand.vmem [shape: f32[3,1,128], index: 5, kind: input, shape index: {}]   ;;  %s1274_s6 = inlined_call_operand.vmem [shape: f32[3,1,128], index: 6, kind: input, shape index: {}]   ;;  %s1275_s7 = inlined_call_operand.hbm [shape: f32[128,128], index: 7, kind: input, shape index: {}]   ;;  %s1276_s8 = inlined_call_operand.vmem [shape: f32[1,128], index: 8, kind: input, shape index: {}]   ;;  %s1277_s9 = inlined_call_operand.hbm [shape: f32[8,128], index: 9, kind: output, shape index: {}]  }
   0x1   :  { %15 = vsyncpa [#allocation6], 0 }
   0x2   :  { %16 = vsyncpa [#allocation4], 0  ;;  %s1039_s30 = smov [#allocation5]   ;;  %s1040_s11 = smov [#allocation2]  }
   0x3   :  { %s38_s10 = sshll.u32 %s1039_s30, 4  ;;  %s24_s12 = sshll.u32 %s1040_s11, 4  ;;  %s39_s10 = int_to_ptr.vmem [resolvable:$true] %s38_s10  ;;  %s25_s12 = int_to_ptr.vmem [resolvable:$true] %s24_s12 }
   0x4   :  { %s961_s13 = scalar_lea.vmem %s39_s10, 6144  ;;  %p966_p1 = scmp.lt.s32.totalorder %s39_s10, %s39_s10 }
   0x5   :  { %p962_p0 = scmp.ne.s32.totalorder %s39_s10, %s961_s13  ;;  %p967_p2 = scmp.lt.s32.totalorder %s961_s13, %s961_s13 }
   0x7   :  { %p968_p3 = por %p967_p2, %p966_p1 }
   0x9   :  { %p969_p4 = pnand %p968_p3, %p962_p0 }
   0xb   :  { %972 = shalt.err (!%p969_p4)
}
   0xc   :  { %s1041_s14 = smov 128   ;;  %s1042_s15 = smov 8  }
   0xd   :  { %44 = dma.hbm_to_vmem [thread:$0]  %s1271_s3, 6144, %s39_s10, [#allocation6], %s1041_s14, %s1041_s14, %s1042_s15  }
   0xe   :  { %s981_s18 = scalar_lea.vmem %s25_s12, 2048  ;;  %p986_p6 = scmp.lt.s32.totalorder %s25_s12, %s25_s12 }
   0xf   :  { %p982_p5 = scmp.ne.s32.totalorder %s25_s12, %s981_s18  ;;  %p987_p7 = scmp.lt.s32.totalorder %s981_s18, %s981_s18 }
  0x11   :  { %p988_p8 = por %p987_p7, %p986_p6 }
  0x13   :  { %p989_p9 = pnand %p988_p8, %p982_p5 }
  0x15   :  { %992 = shalt.err (!%p989_p9)
}
  0x16   :  { %30 = dma.hbm_to_vmem [thread:$0]  %s1269_s1, 2048, %s25_s12, [#allocation3], %s1041_s14, %s1041_s14, %s1042_s15  }
  0x17   :  { %s1043_s21 = smov [#allocation7]  }
  0x18   :  { %s56_s22 = sshll.u32 %s1043_s21, 4  ;;  %s57_s22 = int_to_ptr.vmem [resolvable:$true] %s56_s22 }
  0x19   :  { %s1001_s23 = scalar_lea.vmem %s57_s22, 2048  ;;  %p1006_p11 = scmp.lt.s32.totalorder %s57_s22, %s57_s22 }
  0x1a   :  { %p1002_p10 = scmp.ne.s32.totalorder %s57_s22, %s1001_s23  ;;  %p1007_p12 = scmp.lt.s32.totalorder %s1001_s23, %s1001_s23 }
  0x1c   :  { %p1008_p13 = por %p1007_p12, %p1006_p11 }
  0x1e   :  { %p1009_p0 = pnand %p1008_p13, %p1002_p10 }
  0x20   :  { %1012 = shalt.err (!%p1009_p0)
}
  0x21   :  { %62 = dma.hbm_to_vmem [thread:$0]  %s1275_s7, 2048, %s57_s22, [#allocation6], %s1041_s14, %s1041_s14, %s1042_s15  }
  0x22   :  { %1033 = dma.done.wait [#allocation3], 2048  }
  0x23   :  { %1034 = vsyncadd [#allocation3], 4294965248 }
  0x24   :  { %1035 = dma.done.wait [#allocation6], 8192  }
  0x25   :  { %1036 = vsyncadd [#allocation6], 4294959104  ;;  %v1044_v0 = vmov 0.0   ;;  %vm1045_vm0 = vmmov 0   ;;  %v90_v1 = vld [vmem:[#allocation2 + $0x78] sm:$0xff]  ;;  %v89_v2 = vld [vmem:[#allocation2 + $0x70] sm:$0xff] }
  0x26   :  { %764 = vmatprep.subr.mxu0 %v1044_v0  ;;  %796 = vmatprep.mubr.msk.f32.mxu0 %vm1045_vm0, %v1044_v0  ;;  %v88_v3 = vld [vmem:[#allocation2 + $0x68] sm:$0xff]  ;;  %v87_v4 = vld [vmem:[#allocation2 + $0x60] sm:$0xff]  ;;  %v184_v5 = vld [vmem:[#allocation5 + $0x78] sm:$0xff]  ;;  %s1046_s23 = smov [#allocation8]  }
  0x27   :  { %799 = vmatprep.subr.mxu1 %v1044_v0  ;;  %831 = vmatprep.mubr.msk.f32.mxu1 %vm1045_vm0, %v1044_v0  ;;  %v86_v6 = vld [vmem:[#allocation2 + $0x58] sm:$0xff]  ;;  %v183_v7 = vld [vmem:[#allocation5 + $0x70] sm:$0xff]  ;;  %v182_v8 = vld [vmem:[#allocation5 + $0x68] sm:$0xff]  ;;  %s652_s3 = sshll.u32 %s1046_s23, 4  ;;  %s653_s3 = int_to_ptr.vmem [resolvable:$true] %s652_s3 }
  0x28   :  { %765 = vmatpush3.msra.mxu0 %v90_v1  ;;  %800 = vmatpush3.msra.mxu1 %v184_v5  ;;  %v85_v9 = vld [vmem:[#allocation2 + $0x50] sm:$0xff]  ;;  %v181_v10 = vld [vmem:[#allocation5 + $0x60] sm:$0xff]  ;;  %v84_v11 = vld [vmem:[#allocation2 + $0x48] sm:$0xff]  ;;  %p1018_p2 = scmp.lt.s32.totalorder %s653_s3, %s653_s3 }
  0x29   :  { %766 = vmatprep.subr.mxu0 %v1044_v0  ;;  %801 = vmatprep.subr.mxu1 %v1044_v0  ;;  %v180_v12 = vld [vmem:[#allocation5 + $0x58] sm:$0xff]  ;;  %v83_v13 = vld [vmem:[#allocation2 + $0x40] sm:$0xff]  ;;  %v179_v14 = vld [vmem:[#allocation5 + $0x50] sm:$0xff] }
  0x2a   :  { %767 = vmatpush3.msra.mxu0 %v89_v2  ;;  %802 = vmatpush3.msra.mxu1 %v183_v7  ;;  %v82_v15 = vld [vmem:[#allocation2 + $0x38] sm:$0xff]  ;;  %v178_v16 = vld [vmem:[#allocation5 + $0x48] sm:$0xff]  ;;  %v81_v17 = vld [vmem:[#allocation2 + $0x30] sm:$0xff] }
  0x2b   :  { %768 = vmatprep.subr.mxu0 %v1044_v0  ;;  %803 = vmatprep.subr.mxu1 %v1044_v0  ;;  %v177_v18 = vld [vmem:[#allocation5 + $0x40] sm:$0xff]  ;;  %v80_v19 = vld [vmem:[#allocation2 + $0x28] sm:$0xff]  ;;  %v176_v20 = vld [vmem:[#allocation5 + $0x38] sm:$0xff] }
  0x2c   :  { %769 = vmatpush3.msra.mxu0 %v88_v3  ;;  %804 = vmatpush3.msra.mxu1 %v182_v8  ;;  %v79_v21 = vld [vmem:[#allocation2 + $0x20] sm:$0xff]  ;;  %v175_v22 = vld [vmem:[#allocation5 + $0x30] sm:$0xff]  ;;  %v78_v23 = vld [vmem:[#allocation2 + $0x18] sm:$0xff] }
  0x2d   :  { %770 = vmatprep.subr.mxu0 %v1044_v0  ;;  %805 = vmatprep.subr.mxu1 %v1044_v0  ;;  %v174_v24 = vld [vmem:[#allocation5 + $0x28] sm:$0xff]  ;;  %v77_v25 = vld [vmem:[#allocation2 + $0x10] sm:$0xff]  ;;  %v173_v26 = vld [vmem:[#allocation5 + $0x20] sm:$0xff] }
  0x2e   :  { %771 = vmatpush3.msra.mxu0 %v87_v4  ;;  %806 = vmatpush3.msra.mxu1 %v181_v10  ;;  %v76_v27 = vld [vmem:[#allocation2 + $0x8] sm:$0xff]  ;;  %v172_v28 = vld [vmem:[#allocation5 + $0x18] sm:$0xff]  ;;  %v75_v29 = vld [vmem:[#allocation2] sm:$0xff] }
  0x2f   :  { %772 = vmatprep.subr.mxu0 %v1044_v0  ;;  %807 = vmatprep.subr.mxu1 %v1044_v0  ;;  %v74_v30 = vld [vmem:[%s1268_s0] sm:$0xff]  ;;  %v171_v31 = vld [vmem:[#allocation5 + $0x10] sm:$0xff]  ;;  %v170_v32 = vld [vmem:[#allocation5 + $0x8] sm:$0xff] }
  0x30   :  { %773 = vmatpush3.msra.mxu0 %v86_v6  ;;  %808 = vmatpush3.msra.mxu1 %v180_v12  ;;  %v169_v33 = vld [vmem:[#allocation5] sm:$0xff]  ;;  %v310_v44 = vld [vmem:[#allocation5 + $0xf8] sm:$0xff]  ;;  %v309_v45 = vld [vmem:[#allocation5 + $0xf0] sm:$0xff] }
  0x31   :  { %774 = vmatprep.subr.mxu0 %v1044_v0  ;;  %809 = vmatprep.subr.mxu1 %v1044_v0  ;;  %v662_v34 = vld [vmem:[%s1270_s2] ss:$0 sm:$0xff]  ;;  %v308_v46 = vld [vmem:[#allocation5 + $0xe8] sm:$0xff]  ;;  %v306_v48 = vld [vmem:[#allocation5 + $0xd8] sm:$0xff] }
  0x32   :  { %775 = vmatpush3.msra.mxu0 %v85_v9  ;;  %810 = vmatpush3.msra.mxu1 %v179_v14  ;;  %v663_v39 = vld [vmem:[%s1272_s4] ss:$0 sm:$0xff]  ;;  %v305_v49 = vld [vmem:[#allocation5 + $0xd0] sm:$0xff]  ;;  %v304_v50 = vld [vmem:[#allocation5 + $0xc8] sm:$0xff] }
  0x33   :  { %776 = vmatprep.subr.mxu0 %v1044_v0  ;;  %811 = vmatprep.subr.mxu1 %v1044_v0  ;;  %v307_v47 = vld [vmem:[#allocation5 + $0xe0] sm:$0xff]  ;;  %v302_v52 = vld [vmem:[#allocation5 + $0xb8] sm:$0xff]  ;;  %v301_v53 = vld [vmem:[#allocation5 + $0xb0] sm:$0xff] }
  0x34   :  { %777 = vmatpush3.msra.mxu0 %v84_v11  ;;  %812 = vmatpush3.msra.mxu1 %v178_v16  ;;  %v303_v51 = vld [vmem:[#allocation5 + $0xc0] sm:$0xff]  ;;  %v300_v54 = vld [vmem:[#allocation5 + $0xa8] sm:$0xff]  ;;  %v298_v56 = vld [vmem:[#allocation5 + $0x98] sm:$0xff] }
  0x35   :  { %778 = vmatprep.subr.mxu0 %v1044_v0  ;;  %813 = vmatprep.subr.mxu1 %v1044_v0  ;;  %v299_v55 = vld [vmem:[#allocation5 + $0xa0] sm:$0xff]  ;;  %v297_v57 = vld [vmem:[#allocation5 + $0x90] sm:$0xff]  ;;  %v296_v58 = vld [vmem:[#allocation5 + $0x88] sm:$0xff] }
  0x36   :  { %779 = vmatpush3.msra.mxu0 %v83_v13  ;;  %814 = vmatpush3.msra.mxu1 %v177_v18  ;;  %v295_v59 = vld [vmem:[#allocation5 + $0x80] sm:$0xff] }
  0x37   :  { %780 = vmatprep.subr.mxu0 %v1044_v0  ;;  %815 = vmatprep.subr.mxu1 %v1044_v0  ;;  %v664_v7 = vld [vmem:[%s1273_s5] ss:$0 sm:$0xff]  ;;  %v667_v14 = vld [vmem:[%s1272_s4 + $0x1] ss:$0 sm:$0xff] }
  0x38   :  { %781 = vmatpush3.msra.mxu0 %v82_v15  ;;  %816 = vmatpush3.msra.mxu1 %v176_v20  ;;  %v665_v9 = vld [vmem:[%s1274_s6] ss:$0 sm:$0xff]  ;;  %v438_v20 = vld [vmem:[#allocation5 + $0x170] sm:$0xff] }
  0x39   :  { %782 = vmatprep.subr.mxu0 %v1044_v0  ;;  %817 = vmatprep.subr.mxu1 %v1044_v0 }
  0x3a   :  { %783 = vmatpush3.msra.mxu0 %v81_v17  ;;  %818 = vmatpush3.msra.mxu1 %v175_v22  ;;  %v436_v22 = vld [vmem:[#allocation5 + $0x160] sm:$0xff] }
  0x3b   :  { %784 = vmatprep.subr.mxu0 %v1044_v0  ;;  %819 = vmatprep.subr.mxu1 %v1044_v0 }
  0x3c   :  { %785 = vmatpush3.msra.mxu0 %v80_v19  ;;  %820 = vmatpush3.msra.mxu1 %v174_v24  ;;  %v439_v19 = vld [vmem:[#allocation5 + $0x178] sm:$0xff]  ;;  %v434_v24 = vld [vmem:[#allocation5 + $0x150] sm:$0xff] }
  0x3d   :  { %786 = vmatprep.subr.mxu0 %v1044_v0  ;;  %821 = vmatprep.subr.mxu1 %v1044_v0 }
  0x3e   :  { %787 = vmatpush3.msra.mxu0 %v79_v21  ;;  %822 = vmatpush3.msra.mxu1 %v173_v26  ;;  %v437_v21 = vld [vmem:[#allocation5 + $0x168] sm:$0xff]  ;;  %v432_v26 = vld [vmem:[#allocation5 + $0x140] sm:$0xff] }
  0x3f   :  { %788 = vmatprep.subr.mxu0 %v1044_v0  ;;  %823 = vmatprep.subr.mxu1 %v1044_v0 }
  0x40   :  { %789 = vmatpush3.msra.mxu0 %v78_v23  ;;  %824 = vmatpush3.msra.mxu1 %v172_v28  ;;  %v435_v23 = vld [vmem:[#allocation5 + $0x158] sm:$0xff]  ;;  %v430_v28 = vld [vmem:[#allocation5 + $0x130] sm:$0xff] }
  0x41   :  { %790 = vmatprep.subr.mxu0 %v1044_v0  ;;  %825 = vmatprep.subr.mxu1 %v1044_v0 }
  0x42   :  { %791 = vmatpush3.msra.mxu0 %v77_v25  ;;  %826 = vmatpush3.msra.mxu1 %v171_v31  ;;  %v433_v25 = vld [vmem:[#allocation5 + $0x148] sm:$0xff]  ;;  %v427_v31 = vld [vmem:[#allocation5 + $0x118] sm:$0xff] }
  0x43   :  { %792 = vmatprep.subr.mxu0 %v1044_v0  ;;  %827 = vmatprep.subr.mxu1 %v1044_v0 }
  0x44   :  { %793 = vmatpush3.msra.mxu0 %v76_v27  ;;  %828 = vmatpush3.msra.mxu1 %v170_v32  ;;  %v431_v27 = vld [vmem:[#allocation5 + $0x138] sm:$0xff]  ;;  %v426_v32 = vld [vmem:[#allocation5 + $0x110] sm:$0xff] }
  0x45   :  { %794 = vmatprep.subr.mxu0 %v1044_v0  ;;  %829 = vmatprep.subr.mxu1 %v1044_v0 }
  0x46   :  { %795 = vmatpush3.msra.mxu0 %v75_v29  ;;  %830 = vmatpush3.msra.mxu1 %v169_v33  ;;  %v429_v29 = vld [vmem:[#allocation5 + $0x128] sm:$0xff] }
  0x47   :  { %797 = vmatmul.mubr.f32.vlgmr.msra.gmra.mxu0 %v74_v30  ;;  %834 = vmatprep.subr.mxu0 %v1044_v0  ;;  %v428_v30 = vld [vmem:[#allocation5 + $0x120] sm:$0xff]  ;;  %v425_v33 = vld [vmem:[#allocation5 + $0x108] sm:$0xff] }
  0x48   :  { %866 = vmatprep.mubr.msk.f32.mxu0 %vm1045_vm0, %v1044_v0  ;;  %869 = vmatprep.subr.mxu1 %v1044_v0 }
  0x49   :  { %835 = vmatpush3.msra.mxu0 %v310_v44 }
  0x4a   :  { %836 = vmatprep.subr.mxu0 %v1044_v0 }
  0x4b   :  { %837 = vmatpush3.msra.mxu0 %v309_v45  ;;  %v669_v45 = vld [vmem:[%s1273_s5 + $0x1] ss:$0 sm:$0xff] }
  0x4c   :  { %838 = vmatprep.subr.mxu0 %v1044_v0 }
  0x4d   :  { %839 = vmatpush3.msra.mxu0 %v308_v46 }
  0x4e   :  { %840 = vmatprep.subr.mxu0 %v1044_v0 }
  0x4f   :  { %841 = vmatpush3.msra.mxu0 %v307_v47  ;;  %v671_v47 = vld [vmem:[%s1274_s6 + $0x1] ss:$0 sm:$0xff] }
  0x50   :  { %842 = vmatprep.subr.mxu0 %v1044_v0 }
  0x51   :  { %843 = vmatpush3.msra.mxu0 %v306_v48 }
  0x52   :  { %844 = vmatprep.subr.mxu0 %v1044_v0 }
  0x53   :  { %845 = vmatpush3.msra.mxu0 %v305_v49 }
  0x54   :  { %846 = vmatprep.subr.mxu0 %v1044_v0 }
  0x55   :  { %847 = vmatpush3.msra.mxu0 %v304_v50 }
  0x56   :  { %848 = vmatprep.subr.mxu0 %v1044_v0 }
  0x57   :  { %849 = vmatpush3.msra.mxu0 %v303_v51 }
  0x58   :  { %850 = vmatprep.subr.mxu0 %v1044_v0 }
  0x59   :  { %851 = vmatpush3.msra.mxu0 %v302_v52  ;;  %v673_v52 = vld [vmem:[%s1272_s4 + $0x2] ss:$0 sm:$0xff] }
  0x5a   :  { %852 = vmatprep.subr.mxu0 %v1044_v0 }
  0x5b   :  { %853 = vmatpush3.msra.mxu0 %v301_v53 }
  0x5c   :  { %854 = vmatprep.subr.mxu0 %v1044_v0 }
  0x5d   :  { %855 = vmatpush3.msra.mxu0 %v300_v54 }
  0x5e   :  { %856 = vmatprep.subr.mxu0 %v1044_v0 }
  0x5f   :  { %857 = vmatpush3.msra.mxu0 %v299_v55 }
  0x60   :  { %858 = vmatprep.subr.mxu0 %v1044_v0 }
  0x61   :  { %859 = vmatpush3.msra.mxu0 %v298_v56 }
  0x62   :  { %860 = vmatprep.subr.mxu0 %v1044_v0 }
  0x63   :  { %861 = vmatpush3.msra.mxu0 %v297_v57  ;;  %v567_v57 = vld [vmem:[#allocation7 + $0x78] sm:$0xff] }
  0x64   :  { %862 = vmatprep.subr.mxu0 %v1044_v0 }
  0x65   :  { %863 = vmatpush3.msra.mxu0 %v296_v58  ;;  %v566_v58 = vld [vmem:[#allocation7 + $0x70] sm:$0xff] }
  0x66   :  { %864 = vmatprep.subr.mxu0 %v1044_v0 }
  0x67   :  { %865 = vmatpush3.msra.mxu0 %v295_v59  ;;  %v565_v59 = vld [vmem:[#allocation7 + $0x68] sm:$0xff] }
  0x68   :  { %904 = vmatprep.subr.mxu0 %v1044_v0 }
 0x107   :  { %v164_v35 = vpop.f32.mrf.mxu0 }
 0x108   :  { %v1152_v36 = vadd.f32 %v662_v34, %v164_v35  ;;  %v424_v34 = vld [vmem:[#allocation5 + $0x100] sm:$0xff] }
 0x109   :  { %v798_v37 = vpop.f32.mrf.mxu0 }
 0x10a   :  { %v168_v38 = vmax.f32 %v1152_v36, 0.0 }
 0x10c   :  { %832 = vmatmul.mubr.f32.vlgmr.msra.gmra.mxu1 %v168_v38 }
 0x10d   :  { %901 = vmatprep.mubr.msk.f32.mxu1 %vm1045_vm0, %v1044_v0  ;;  %870 = vmatpush3.msra.mxu1 %v439_v19 }
 0x10e   :  { %871 = vmatprep.subr.mxu1 %v1044_v0 }
 0x10f   :  { %872 = vmatpush3.msra.mxu1 %v438_v20  ;;  %v675_v20 = vld [vmem:[%s1273_s5 + $0x2] ss:$0 sm:$0xff]  ;;  %s1013_s5 = scalar_lea.vmem %s653_s3, 128 }
 0x110   :  { %873 = vmatprep.subr.mxu1 %v1044_v0  ;;  %p1014_p1 = scmp.ne.s32.totalorder %s653_s3, %s1013_s5  ;;  %p1019_p3 = scmp.lt.s32.totalorder %s1013_s5, %s1013_s5 }
 0x111   :  { %874 = vmatpush3.msra.mxu1 %v437_v21 }
 0x112   :  { %875 = vmatprep.subr.mxu1 %v1044_v0  ;;  %p1020_p4 = por %p1019_p3, %p1018_p2 }
 0x113   :  { %876 = vmatpush3.msra.mxu1 %v436_v22 }
 0x114   :  { %877 = vmatprep.subr.mxu1 %v1044_v0  ;;  %p1021_p5 = pnand %p1020_p4, %p1014_p1 }
 0x115   :  { %878 = vmatpush3.msra.mxu1 %v435_v23 }
 0x116   :  { %879 = vmatprep.subr.mxu1 %v1044_v0 }
 0x117   :  { %880 = vmatpush3.msra.mxu1 %v434_v24 }
 0x118   :  { %881 = vmatprep.subr.mxu1 %v1044_v0 }
 0x119   :  { %882 = vmatpush3.msra.mxu1 %v433_v25 }
 0x11a   :  { %883 = vmatprep.subr.mxu1 %v1044_v0 }
 0x11b   :  { %884 = vmatpush3.msra.mxu1 %v432_v26  ;;  %v678_v26 = vld [vmem:[%s1276_s8] ss:$0 sm:$0xff] }
 0x11c   :  { %885 = vmatprep.subr.mxu1 %v1044_v0 }
 0x11d   :  { %886 = vmatpush3.msra.mxu1 %v431_v27 }
 0x11e   :  { %887 = vmatprep.subr.mxu1 %v1044_v0 }
 0x11f   :  { %888 = vmatpush3.msra.mxu1 %v430_v28 }
 0x120   :  { %889 = vmatprep.subr.mxu1 %v1044_v0 }
 0x121   :  { %890 = vmatpush3.msra.mxu1 %v429_v29 }
 0x122   :  { %891 = vmatprep.subr.mxu1 %v1044_v0 }
 0x123   :  { %892 = vmatpush3.msra.mxu1 %v428_v30 }
 0x124   :  { %893 = vmatprep.subr.mxu1 %v1044_v0 }
 0x125   :  { %894 = vmatpush3.msra.mxu1 %v427_v31 }
 0x126   :  { %895 = vmatprep.subr.mxu1 %v1044_v0 }
 0x127   :  { %896 = vmatpush3.msra.mxu1 %v426_v32 }
 0x128   :  { %897 = vmatprep.subr.mxu1 %v1044_v0 }
 0x129   :  { %898 = vmatpush3.msra.mxu1 %v425_v33 }
 0x12a   :  { %899 = vmatprep.subr.mxu1 %v1044_v0 }
 0x12b   :  { %900 = vmatpush3.msra.mxu1 %v424_v34 }
 0x1cc   :  { %v258_v40 = vpop.f32.mrf.mxu1 }
 0x1cd   :  { %v1162_v41 = vadd.f32 %v663_v39, %v258_v40 }
 0x1ce   :  { %v833_v42 = vpop.f32.mrf.mxu1 }
 0x1cf   :  { %262 = vadd.xlane.f32.xlu0 %v1162_v41  ;;  %v264_v43 = vmul.f32 %v1162_v41, %v1162_v41 }
 0x1d3   :  { %265 = vadd.xlane.f32.xlu0 %v264_v43 }
 0x258   :  { %v263_v60 = vpop.xlane.xlu0 %262 }
 0x259   :  { %v267_v61 = vmul.f32 0.03125, %v263_v60  ;;  %v564_v60 = vld [vmem:[#allocation7 + $0x60] sm:$0xff] }
 0x25b   :  { %v269_v63 = vmul.f32 %v267_v61, %v267_v61  ;;  %v272_v5 = vsub.f32 %v1162_v41, %v267_v61  ;;  %v563_v61 = vld [vmem:[#allocation7 + $0x58] sm:$0xff] }
 0x25c   :  { %v266_v62 = vpop.xlane.xlu0 %265 }
 0x25d   :  { %v268_v1 = vmul.f32 0.03125, %v266_v62  ;;  %v562_v62 = vld [vmem:[#allocation7 + $0x50] sm:$0xff] }
 0x25f   :  { %v270_v2 = vsub.f32 %v268_v1, %v269_v63  ;;  %v561_v63 = vld [vmem:[#allocation7 + $0x48] sm:$0xff]  ;;  %v560_v1 = vld [vmem:[#allocation7 + $0x40] sm:$0xff] }
 0x261   :  { %v271_v3 = vmax.f32 %v270_v2, 0.0  ;;  %v559_v2 = vld [vmem:[#allocation7 + $0x38] sm:$0xff] }
 0x263   :  { %v273_v4 = vadd.f32 1e-05, %v271_v3  ;;  %v558_v3 = vld [vmem:[#allocation7 + $0x30] sm:$0xff] }
 0x265   :  { %947 = vrsqrt.f32 %v273_v4  ;;  %v557_v4 = vld [vmem:[#allocation7 + $0x28] sm:$0xff] }
 0x272   :  { %v948_v6 = vpop.eup %947 }
 0x273   :  { %v275_v8 = vmul.f32 %v948_v6, %v272_v5  ;;  %v556_v5 = vld [vmem:[#allocation7 + $0x20] sm:$0xff]  ;;  %v555_v6 = vld [vmem:[#allocation7 + $0x18] sm:$0xff] }
 0x275   :  { %v283_v10 = vmul.f32 %v664_v7, %v275_v8  ;;  %v554_v7 = vld [vmem:[#allocation7 + $0x10] sm:$0xff]  ;;  %v553_v8 = vld [vmem:[#allocation7 + $0x8] sm:$0xff] }
 0x277   :  { %v291_v11 = vadd.f32 %v665_v9, %v283_v10  ;;  %v552_v9 = vld [vmem:[#allocation7] sm:$0xff] }
 0x279   :  { %v292_v12 = vmax.f32 %v291_v11, 0.0 }
 0x27b   :  { %v1192_v13 = vadd.f32 %v292_v12, %v168_v38 }
 0x27d   :  { %867 = vmatmul.mubr.f32.vlgmr.msra.gmra.mxu0 %v1192_v13 }
 0x27e   :  { %936 = vmatprep.mubr.msk.f32.mxu0 %vm1045_vm0, %v1044_v0  ;;  %905 = vmatpush3.msra.mxu0 %v567_v57 }
 0x27f   :  { %906 = vmatprep.subr.mxu0 %v1044_v0 }
 0x280   :  { %907 = vmatpush3.msra.mxu0 %v566_v58 }
 0x281   :  { %908 = vmatprep.subr.mxu0 %v1044_v0 }
 0x282   :  { %909 = vmatpush3.msra.mxu0 %v565_v59 }
 0x283   :  { %910 = vmatprep.subr.mxu0 %v1044_v0 }
 0x284   :  { %911 = vmatpush3.msra.mxu0 %v564_v60 }
 0x285   :  { %912 = vmatprep.subr.mxu0 %v1044_v0 }
 0x286   :  { %913 = vmatpush3.msra.mxu0 %v563_v61 }
 0x287   :  { %914 = vmatprep.subr.mxu0 %v1044_v0 }
 0x288   :  { %915 = vmatpush3.msra.mxu0 %v562_v62 }
 0x289   :  { %916 = vmatprep.subr.mxu0 %v1044_v0 }
 0x28a   :  { %917 = vmatpush3.msra.mxu0 %v561_v63 }
 0x28b   :  { %918 = vmatprep.subr.mxu0 %v1044_v0 }
 0x28c   :  { %919 = vmatpush3.msra.mxu0 %v560_v1 }
 0x28d   :  { %920 = vmatprep.subr.mxu0 %v1044_v0 }
 0x28e   :  { %921 = vmatpush3.msra.mxu0 %v559_v2 }
 0x28f   :  { %922 = vmatprep.subr.mxu0 %v1044_v0 }
 0x290   :  { %923 = vmatpush3.msra.mxu0 %v558_v3 }
 0x291   :  { %924 = vmatprep.subr.mxu0 %v1044_v0 }
 0x292   :  { %925 = vmatpush3.msra.mxu0 %v557_v4 }
 0x293   :  { %926 = vmatprep.subr.mxu0 %v1044_v0 }
 0x294   :  { %927 = vmatpush3.msra.mxu0 %v556_v5 }
 0x295   :  { %928 = vmatprep.subr.mxu0 %v1044_v0 }
 0x296   :  { %929 = vmatpush3.msra.mxu0 %v555_v6 }
 0x297   :  { %930 = vmatprep.subr.mxu0 %v1044_v0 }
 0x298   :  { %931 = vmatpush3.msra.mxu0 %v554_v7 }
 0x299   :  { %932 = vmatprep.subr.mxu0 %v1044_v0 }
 0x29a   :  { %933 = vmatpush3.msra.mxu0 %v553_v8 }
 0x29b   :  { %934 = vmatprep.subr.mxu0 %v1044_v0  ;;  %v677_v0 = vld [vmem:[%s1274_s6 + $0x2] ss:$0 sm:$0xff] }
 0x29c   :  { %935 = vmatpush3.msra.mxu0 %v552_v9 }
 0x33d   :  { %v385_v15 = vpop.f32.mrf.mxu0 }
 0x33e   :  { %v1200_v16 = vadd.f32 %v667_v14, %v385_v15 }
 0x33f   :  { %v868_v17 = vpop.f32.mrf.mxu0 }
 0x340   :  { %389 = vadd.xlane.f32.xlu1 %v1200_v16  ;;  %v391_v18 = vmul.f32 %v1200_v16, %v1200_v16 }
 0x344   :  { %392 = vadd.xlane.f32.xlu1 %v391_v18 }
 0x3c9   :  { %v390_v35 = vpop.xlane.xlu1 %389 }
 0x3ca   :  { %v394_v36 = vmul.f32 0.03125, %v390_v35 }
 0x3cc   :  { %v396_v38 = vmul.f32 %v394_v36, %v394_v36  ;;  %v399_v43 = vsub.f32 %v1200_v16, %v394_v36 }
 0x3cd   :  { %v393_v37 = vpop.xlane.xlu1 %392 }
 0x3ce   :  { %v395_v39 = vmul.f32 0.03125, %v393_v37 }
 0x3d0   :  { %v397_v40 = vsub.f32 %v395_v39, %v396_v38 }
 0x3d2   :  { %v398_v41 = vmax.f32 %v397_v40, 0.0 }
 0x3d4   :  { %v400_v42 = vadd.f32 1e-05, %v398_v41 }
 0x3d6   :  { %949 = vrsqrt.f32 %v400_v42 }
 0x3e3   :  { %v950_v44 = vpop.eup %949 }
 0x3e4   :  { %v402_v46 = vmul.f32 %v950_v44, %v399_v43 }
 0x3e6   :  { %v411_v48 = vmul.f32 %v669_v45, %v402_v46 }
 0x3e8   :  { %v420_v49 = vadd.f32 %v671_v47, %v411_v48 }
 0x3ea   :  { %v421_v50 = vmax.f32 %v420_v49, 0.0 }
 0x3ec   :  { %v1228_v51 = vadd.f32 %v421_v50, %v1192_v13 }
 0x3ee   :  { %902 = vmatmul.mubr.f32.vlgmr.msra.gmra.mxu1 %v1228_v51 }
 0x4ae   :  { %v514_v53 = vpop.f32.mrf.mxu1 }
 0x4af   :  { %v1234_v54 = vadd.f32 %v673_v52, %v514_v53 }
 0x4b0   :  { %v903_v55 = vpop.f32.mrf.mxu1 }
 0x4b1   :  { %518 = vadd.xlane.f32.xlu0 %v1234_v54  ;;  %v520_v56 = vmul.f32 %v1234_v54, %v1234_v54 }
 0x4b3   :  { %521 = vadd.xlane.f32.xlu1 %v520_v56 }
 0x53a   :  { %v519_v10 = vpop.xlane.xlu0 %518 }
 0x53b   :  { %v523_v11 = vmul.f32 0.03125, %v519_v10 }
 0x53c   :  { %v522_v12 = vpop.xlane.xlu1 %521 }
 0x53d   :  { %v525_v13 = vmul.f32 %v523_v11, %v523_v11  ;;  %v524_v14 = vmul.f32 0.03125, %v522_v12  ;;  %v528_v18 = vsub.f32 %v1234_v54, %v523_v11 }
 0x53f   :  { %v526_v15 = vsub.f32 %v524_v14, %v525_v13 }
 0x541   :  { %v527_v16 = vmax.f32 %v526_v15, 0.0 }
 0x543   :  { %v529_v17 = vadd.f32 1e-05, %v527_v16 }
 0x545   :  { %951 = vrsqrt.f32 %v529_v17 }
 0x552   :  { %v952_v19 = vpop.eup %951 }
 0x553   :  { %v531_v21 = vmul.f32 %v952_v19, %v528_v18 }
 0x555   :  { %v540_v22 = vmul.f32 %v675_v20, %v531_v21 }
 0x557   :  { %v549_v23 = vadd.f32 %v677_v0, %v540_v22 }
 0x559   :  { %v550_v24 = vmax.f32 %v549_v23, 0.0 }
 0x55b   :  { %v551_v25 = vadd.f32 %v550_v24, %v1228_v51 }
 0x55d   :  { %937 = vmatmul.mubr.f32.vlgmr.msra.gmra.mxu0 %v551_v25 }
 0x61d   :  { %v641_v27 = vpop.f32.mrf.mxu0 }
 0x61e   :  { %v642_v28 = vadd.f32 %v678_v26, %v641_v27 }
 0x61f   :  { %v938_v29 = vpop.f32.mrf.mxu0 }
 0x620   :  { %645 = vst [vmem:[#allocation8] sm:$0xff] %v642_v28 }
 0x621   :  { %1024 = shalt.err (!%p1021_p5)
}
 0x622   :  { %655 = dma.vmem_to_hbm [thread:$0]  %s653_s3, 128, %s1277_s9, [#allocation4]  }
 0x623   :  { %1037 = dma.done.wait [#allocation4], 128  }
 0x624   :  { %1038 = vsyncadd [#allocation4], 4294967168 }
 0x625   :  { %659 = vsyncpa [#allocation3], 1 }
 0x626   :  { %660 = vsyncpa [#allocation6], 1 }
 0x627   :  { %661 = vsyncpa [#allocation4], 1 }

</bundles_post_ra>
